<compile_context>
chip_gen: v5e
topology: v5e:2x2
jax: 0.10.0
libtpu: 0.0.40
codegen_flags: <defaults>
</compile_context>

<pallas_src>
import jax
import jax.numpy as jnp
from jax.experimental import pallas as pl
from jax.experimental.pallas import tpu as pltpu

EPS = 1e-5
_VMEM_LIMIT = 48 * 1024 * 1024          # safe on v5e/v6e (128 MiB) and v7x (64 MiB)
_BLOCK_TARGET_BYTES = 2 * 1024 * 1024   # ~2 MiB per (1, T, Ct) f32 block


# -----------------------------------------------------------------------------
# Kernels
# -----------------------------------------------------------------------------
def _revin_norm_kernel(x_ref, w_ref, b_ref, y_ref, mean_ref, std_ref):
    # x_ref: (1, T, Ct) block for one batch element / one feature tile.
    x = x_ref[...].astype(jnp.float32)
    t = x.shape[1]
    inv_t = jnp.float32(1.0 / t)

    # Single sweep over the tile: sum and sum-of-squares.
    s1 = jnp.sum(x, axis=1, keepdims=True)            # (1, 1, Ct)
    s2 = jnp.sum(x * x, axis=1, keepdims=True)        # (1, 1, Ct)
    mean = s1 * inv_t
    var = jnp.maximum(s2 * inv_t - mean * mean, 0.0)  # unbiased=False; guard >= 0
    stdev = jnp.sqrt(var + EPS)

    # Fold normalize + affine into a per-feature scale/shift (tiny-vector divide
    # only; per-element work is a single mul + add).
    inv_std = 1.0 / stdev                              # (1, 1, Ct) — negligible cost
    w = w_ref[...][None].astype(jnp.float32)           # (1, 1, Ct)
    b = b_ref[...][None].astype(jnp.float32)
    scale = w * inv_std
    shift = b - mean * scale

    y_ref[...] = (x * scale + shift).astype(y_ref.dtype)
    mean_ref[...] = mean.astype(mean_ref.dtype)
    std_ref[...] = stdev.astype(std_ref.dtype)


def _revin_denorm_kernel(x_ref, mean_ref, std_ref, w_ref, b_ref, y_ref):
    # Fused inverse: y = ((x - b)/w)*stdev + mean == x*scale + shift with
    #   scale = stdev / w, shift = mean - b*stdev/w.
    mean = mean_ref[...].astype(jnp.float32)            # (1, 1, Ct)
    stdev = std_ref[...].astype(jnp.float32)
    w = w_ref[...][None].astype(jnp.float32)
    b = b_ref[...][None].astype(jnp.float32)

    inv_w = 1.0 / w                                     # tiny-vector divide only
    scale = stdev * inv_w
    shift = mean - b * scale

    x = x_ref[...].astype(jnp.float32)
    y_ref[...] = (x * scale + shift).astype(y_ref.dtype)


# -----------------------------------------------------------------------------
# Tiling helper
# -----------------------------------------------------------------------------
def _pick_c_tile(T, C, target_bytes=_BLOCK_TARGET_BYTES):
    """Feature-tile width: a divisor of C that is a multiple of 128 and keeps a
    (1, T, Ct) f32 block around `target_bytes`. Falls back to full C when the
    feature count is small / not 128-aligned (BlockSpec last dim must be a
    multiple of 128 or the full extent)."""
    if C % 128 != 0:
        # TODO(synk): for C < 128 a lane-dense layout (T on lanes) avoids masked
        # stores, but requires the caller to supply a transposed layout; a
        # wrapper-side transpose would cost an extra HBM pass on this mem-bound op.
        return C
    budget_lanes = max(128, (target_bytes // (T * 4)) // 128 * 128)
    ct = C
    while ct > budget_lanes and ct % 2 == 0 and (ct // 2) % 128 == 0:
        ct //= 2
    # TODO(synk): if T alone is so large that even Ct=128 exceeds VMEM budgets,
    # a T-tiled two-pass variant (accumulate sum/sumsq across T tiles) is needed.
    return ct


# -----------------------------------------------------------------------------
# Wrappers
# -----------------------------------------------------------------------------
def revin_norm(x, weight, bias, c_tile=None):
    """x: (B, T, C). Returns (y, mean, stdev) with mean/stdev of shape (B, 1, C)."""
    B, T, C = x.shape
    ct = _pick_c_tile(T, C) if c_tile is None else c_tile
    assert C % ct == 0, "feature tile must divide C"
    w2 = weight.reshape(1, C)
    b2 = bias.reshape(1, C)
    out_shapes = (
        jax.ShapeDtypeStruct((B, T, C), x.dtype),
        jax.ShapeDtypeStruct((B, 1, C), jnp.float32),
        jax.ShapeDtypeStruct((B, 1, C), jnp.float32),
    )
    return pl.pallas_call(
        _revin_norm_kernel,
        out_shape=out_shapes,
        grid_spec=pltpu.PrefetchScalarGridSpec(
            num_scalar_prefetch=0,
            grid=(B, C // ct),
            in_specs=[
                pl.BlockSpec((1, T, ct), lambda i, j: (i, 0, j)),
                pl.BlockSpec((1, ct), lambda i, j: (0, j)),
                pl.BlockSpec((1, ct), lambda i, j: (0, j)),
            ],
            out_specs=[
                pl.BlockSpec((1, T, ct), lambda i, j: (i, 0, j)),
                pl.BlockSpec((1, 1, ct), lambda i, j: (i, 0, j)),
                pl.BlockSpec((1, 1, ct), lambda i, j: (i, 0, j)),
            ],
        ),
        compiler_params=pltpu.CompilerParams(
            dimension_semantics=("parallel", "parallel"),
            vmem_limit_bytes=_VMEM_LIMIT,
        ),
    )(x, w2, b2)


def revin_denorm(x, mean, stdev, weight, bias, c_tile=None):
    """Inverse of revin_norm. x: (B, T, C), mean/stdev: (B, 1, C)."""
    B, T, C = x.shape
    ct = _pick_c_tile(T, C) if c_tile is None else c_tile
    assert C % ct == 0, "feature tile must divide C"
    w2 = weight.reshape(1, C)
    b2 = bias.reshape(1, C)
    return pl.pallas_call(
        _revin_denorm_kernel,
        out_shape=jax.ShapeDtypeStruct((B, T, C), x.dtype),
        grid_spec=pltpu.PrefetchScalarGridSpec(
            num_scalar_prefetch=0,
            grid=(B, C // ct),
            in_specs=[
                pl.BlockSpec((1, T, ct), lambda i, j: (i, 0, j)),
                pl.BlockSpec((1, 1, ct), lambda i, j: (i, 0, j)),
                pl.BlockSpec((1, 1, ct), lambda i, j: (i, 0, j)),
                pl.BlockSpec((1, ct), lambda i, j: (0, j)),
                pl.BlockSpec((1, ct), lambda i, j: (0, j)),
            ],
            out_specs=pl.BlockSpec((1, T, ct), lambda i, j: (i, 0, j)),
        ),
        compiler_params=pltpu.CompilerParams(
            dimension_semantics=("parallel", "parallel"),
            vmem_limit_bytes=_VMEM_LIMIT,
        ),
    )(x, mean, stdev, w2, b2)


class RevIN:
    """JAX/Pallas port of the PyTorch RevIN module (forward pass)."""

    def __init__(self, num_features: int, eps: float = 1e-5, affine: bool = True):
        self.num_features = num_features
        self.eps = eps
        self.affine = affine
        # With affine=False the PyTorch module skips the affine step entirely;
        # using identity weight/bias here is numerically identical, so the same
        # kernels cover both cases.
        self.affine_weight = jnp.ones((num_features,), dtype=jnp.float32)
        self.affine_bias = jnp.zeros((num_features,), dtype=jnp.float32)
        self.mean = None
        self.stdev = None

    def __call__(self, x, mode: str):
        if mode == "norm":
            y, self.mean, self.stdev = revin_norm(
                x, self.affine_weight, self.affine_bias
            )
            return y
        elif mode == "denorm":
            return revin_denorm(
                x, self.mean, self.stdev, self.affine_weight, self.affine_bias
            )
        else:
            raise NotImplementedError


# -----------------------------------------------------------------------------
# Demo / self-check
# -----------------------------------------------------------------------------
if __name__ == "__main__":
    key = jax.random.PRNGKey(0)

    # --- small shapes matching the module's typical use (B, T, C) -------------
    B, T, C = 2, 8, 4
    x = jax.random.normal(key, (B, T, C), dtype=jnp.float32) * 3.0 + 1.5

    revin = RevIN(num_features=C, eps=EPS, affine=True)
    y = jax.block_until_ready(revin(x, "norm"))

    ref_mean = jnp.mean(x, axis=1, keepdims=True)
    ref_std = jnp.sqrt(jnp.var(x, axis=1, keepdims=True) + EPS)
    ref_y = (x - ref_mean) / ref_std * revin.affine_weight + revin.affine_bias
    assert jnp.allclose(y, ref_y, atol=1e-5), "norm mismatch"
    assert jnp.allclose(revin.mean, ref_mean, atol=1e-5), "mean mismatch"
    assert jnp.allclose(revin.stdev, ref_std, atol=1e-5), "stdev mismatch"

    x_back = jax.block_until_ready(revin(x=y, mode="denorm"))
    assert jnp.allclose(x_back, x, atol=1e-4), "denorm roundtrip mismatch"

    # --- exercise the multi-feature-tile (lane-tiled) path ---------------------
    B2, T2, C2, CT2 = 2, 64, 256, 128
    key2 = jax.random.PRNGKey(1)
    w2 = jax.random.normal(key2, (C2,), jnp.float32) * 0.1 + 1.0
    b2 = jax.random.normal(jax.random.PRNGKey(2), (C2,), jnp.float32) * 0.1
    x2 = jax.random.normal(jax.random.PRNGKey(3), (B2, T2, C2), jnp.float32) * 2.0 - 0.5

    y2, m2, s2 = revin_norm(x2, w2, b2, c_tile=CT2)
    y2 = jax.block_until_ready(y2)
    ref_m2 = jnp.mean(x2, axis=1, keepdims=True)
    ref_s2 = jnp.sqrt(jnp.var(x2, axis=1, keepdims=True) + EPS)
    ref_y2 = (x2 - ref_m2) / ref_s2 * w2 + b2
    assert jnp.allclose(y2, ref_y2, atol=1e-4), "tiled norm mismatch"

    x2_back = jax.block_until_ready(revin_denorm(y2, m2, s2, w2, b2, c_tile=CT2))
    assert jnp.allclose(x2_back, x2, atol=1e-3), "tiled denorm roundtrip mismatch"

    print("KERNEL_OK")
</pallas_src>

<mosaic_0001>
module attributes {stable_mosaic.version = 11 : i64} {
  func.func @_revin_norm_kernel(%arg0: i32, %arg1: i32, %arg2: memref<1x8x4xf32, #tpu.memory_space<vmem>>, %arg3: memref<1x4xf32, #tpu.memory_space<vmem>>, %arg4: memref<1x4xf32, #tpu.memory_space<vmem>>, %arg5: memref<1x8x4xf32, #tpu.memory_space<vmem>>, %arg6: memref<1x1x4xf32, #tpu.memory_space<vmem>>, %arg7: memref<1x1x4xf32, #tpu.memory_space<vmem>>) attributes {dimension_semantics = [#tpu.dimension_semantics<parallel>, #tpu.dimension_semantics<parallel>], iteration_bounds = array<i64: 2, 1>, scalar_prefetch = 0 : i64, scratch_operands = 0 : i64, tpu.core_type = #tpu.core_type<tc>, window_params = [{transform_indices = @transform_0, window_bounds = array<i64: 1, 8, 4>}, {transform_indices = @transform_1, window_bounds = array<i64: 1, 4>}, {transform_indices = @transform_2, window_bounds = array<i64: 1, 4>}, {transform_indices = @transform_3, window_bounds = array<i64: 1, 8, 4>}, {transform_indices = @transform_4, window_bounds = array<i64: 1, 1, 4>}, {transform_indices = @transform_5, window_bounds = array<i64: 1, 1, 4>}]} {
    %c0 = arith.constant 0 : index
    %c0_0 = arith.constant 0 : index
    %c0_1 = arith.constant 0 : index
    %0 = vector.load %arg2[%c0, %c0_0, %c0_1] : memref<1x8x4xf32, #tpu.memory_space<vmem>>, vector<1x8x4xf32>
    %cst = arith.constant dense<0.000000e+00> : vector<1x4xf32>
    %1 = vector.multi_reduction <add>, %0, %cst [1] : vector<1x8x4xf32> to vector<1x4xf32>
    %2 = vector.shape_cast %1 : vector<1x4xf32> to vector<1x1x4xf32>
    %3 = arith.mulf %0, %0 : vector<1x8x4xf32>
    %cst_2 = arith.constant dense<0.000000e+00> : vector<1x4xf32>
    %4 = vector.multi_reduction <add>, %3, %cst_2 [1] : vector<1x8x4xf32> to vector<1x4xf32>
    %5 = vector.shape_cast %4 : vector<1x4xf32> to vector<1x1x4xf32>
    %cst_3 = arith.constant 1.250000e-01 : f32
    %6 = vector.broadcast %cst_3 : f32 to vector<1x1x4xf32>
    %7 = arith.mulf %2, %6 : vector<1x1x4xf32>
    %cst_4 = arith.constant 1.250000e-01 : f32
    %8 = vector.broadcast %cst_4 : f32 to vector<1x1x4xf32>
    %9 = arith.mulf %5, %8 : vector<1x1x4xf32>
    %10 = arith.mulf %7, %7 : vector<1x1x4xf32>
    %11 = arith.subf %9, %10 : vector<1x1x4xf32>
    %cst_5 = arith.constant 0.000000e+00 : f32
    %12 = vector.broadcast %cst_5 : f32 to vector<1x1x4xf32>
    %13 = arith.maximumf %11, %12 : vector<1x1x4xf32>
    %cst_6 = arith.constant 9.99999974E-6 : f32
    %14 = vector.broadcast %cst_6 : f32 to vector<1x1x4xf32>
    %15 = arith.addf %13, %14 : vector<1x1x4xf32>
    %16 = math.sqrt %15 : vector<1x1x4xf32>
    %cst_7 = arith.constant 1.000000e+00 : f32
    %17 = vector.broadcast %cst_7 : f32 to vector<1x1x4xf32>
    %18 = arith.divf %17, %16 : vector<1x1x4xf32>
    %c0_8 = arith.constant 0 : index
    %c0_9 = arith.constant 0 : index
    %19 = vector.load %arg3[%c0_8, %c0_9] : memref<1x4xf32, #tpu.memory_space<vmem>>, vector<1x4xf32>
    %20 = vector.shape_cast %19 : vector<1x4xf32> to vector<1x1x4xf32>
    %c0_10 = arith.constant 0 : index
    %c0_11 = arith.constant 0 : index
    %21 = vector.load %arg4[%c0_10, %c0_11] : memref<1x4xf32, #tpu.memory_space<vmem>>, vector<1x4xf32>
    %22 = vector.shape_cast %21 : vector<1x4xf32> to vector<1x1x4xf32>
    %23 = arith.mulf %20, %18 : vector<1x1x4xf32>
    %24 = arith.mulf %7, %23 : vector<1x1x4xf32>
    %25 = arith.subf %22, %24 : vector<1x1x4xf32>
    %26 = vector.broadcast %23 : vector<1x1x4xf32> to vector<1x8x4xf32>
    %27 = arith.mulf %0, %26 : vector<1x8x4xf32>
    %28 = vector.broadcast %25 : vector<1x1x4xf32> to vector<1x8x4xf32>
    %29 = arith.addf %27, %28 : vector<1x8x4xf32>
    %c0_12 = arith.constant 0 : index
    %c0_13 = arith.constant 0 : index
    %c0_14 = arith.constant 0 : index
    %30 = vector.load %arg5[%c0_12, %c0_13, %c0_14] : memref<1x8x4xf32, #tpu.memory_space<vmem>>, vector<1x8x4xf32>
    tpu.vector_store %arg5[%c0_12, %c0_13, %c0_14], %29 {strides = array<i32>} : memref<1x8x4xf32, #tpu.memory_space<vmem>>, vector<1x8x4xf32>,
    %c0_15 = arith.constant 0 : index
    %c0_16 = arith.constant 0 : index
    %c0_17 = arith.constant 0 : index
    %31 = vector.load %arg6[%c0_15, %c0_16, %c0_17] : memref<1x1x4xf32, #tpu.memory_space<vmem>>, vector<1x1x4xf32>
    tpu.vector_store %arg6[%c0_15, %c0_16, %c0_17], %7 {strides = array<i32>} : memref<1x1x4xf32, #tpu.memory_space<vmem>>, vector<1x1x4xf32>,
    %c0_18 = arith.constant 0 : index
    %c0_19 = arith.constant 0 : index
    %c0_20 = arith.constant 0 : index
    %32 = vector.load %arg7[%c0_18, %c0_19, %c0_20] : memref<1x1x4xf32, #tpu.memory_space<vmem>>, vector<1x1x4xf32>
    tpu.vector_store %arg7[%c0_18, %c0_19, %c0_20], %16 {strides = array<i32>} : memref<1x1x4xf32, #tpu.memory_space<vmem>>, vector<1x1x4xf32>,
    return
  }
  func.func @transform_0(%arg0: i32, %arg1: i32) -> (i32, i32, i32) {
    %c0_i32 = arith.constant 0 : i32
    %c0_i32_0 = arith.constant 0 : i32
    return %arg0, %c0_i32, %arg1 : i32, i32, i32
  }
  func.func @transform_1(%arg0: i32, %arg1: i32) -> (i32, i32) {
    %c0_i32 = arith.constant 0 : i32
    %c0_i32_0 = arith.constant 0 : i32
    return %c0_i32, %arg1 : i32, i32
  }
  func.func @transform_2(%arg0: i32, %arg1: i32) -> (i32, i32) {
    %c0_i32 = arith.constant 0 : i32
    %c0_i32_0 = arith.constant 0 : i32
    return %c0_i32, %arg1 : i32, i32
  }
  func.func @transform_3(%arg0: i32, %arg1: i32) -> (i32, i32, i32) {
    %c0_i32 = arith.constant 0 : i32
    %c0_i32_0 = arith.constant 0 : i32
    return %arg0, %c0_i32, %arg1 : i32, i32, i32
  }
  func.func @transform_4(%arg0: i32, %arg1: i32) -> (i32, i32, i32) {
    %c0_i32 = arith.constant 0 : i32
    %c0_i32_0 = arith.constant 0 : i32
    return %arg0, %c0_i32, %arg1 : i32, i32, i32
  }
  func.func @transform_5(%arg0: i32, %arg1: i32) -> (i32, i32, i32) {
    %c0_i32 = arith.constant 0 : i32
    %c0_i32_0 = arith.constant 0 : i32
    return %arg0, %c0_i32, %arg1 : i32, i32, i32
  }
}

</mosaic_0001>

<bundles_post_ra>
// kernel: tpu_custom_call.1
= control target key start
LH: loop header
LB: loop body
LE: loop exit
PB: predicated region body
PF: predicated region fallthrough
CT: control target
= control target key end

     0   :  { %11 = vsyncpa [#allocation3], 0  ;;  %s929_s0 = inlined_call_operand.vmem [shape: f32[2,8,4], index: 0, kind: input, shape index: {}]   ;;  %s930_s1 = inlined_call_operand.vmem [shape: f32[1,4], index: 1, kind: input, shape index: {}]   ;;  %s931_s2 = inlined_call_operand.vmem [shape: f32[1,4], index: 2, kind: input, shape index: {}]   ;;  %s932_s3 = inlined_call_operand.vmem [shape: f32[2,8,4], index: 3, kind: output, shape index: {0}]   ;;  %s933_s4 = inlined_call_operand.hbm [shape: f32[2,1,4], index: 4, kind: output, shape index: {1}]   ;;  %s934_s5 = inlined_call_operand.hbm [shape: f32[2,1,4], index: 5, kind: output, shape index: {2}]  }
   0x1   :  { %13 = vsyncpa [#allocation3 + $0x1], 0 }
   0x2   :  { %14 = vsyncpa [#allocation5], 0 }
   0x3   :  { %16 = vsyncpa [#allocation5 + $0x1], 0  ;;  %s779_s18 = smov 0   ;;  %s781_s19 = smov 0  }
   0x4   :  { %s783_s20 = smov 0   ;;  %s785_s21 = smov 0  }
   0x5   :  { %s787_s22 = smov 0   ;;  %s789_s23 = smov 0  }
   0x6 LB: > { %s562_s24 = sadd.s32 4294967295, %s747_s23   ;;  %s563_s25 = sadd.s32 4294967294, %s747_s23   ;;  %s747_s23 = sphi %s789_s23, %s22_s23   ;;  %s743_s22 = sphi %s787_s22, %s941_s22   ;;  %s739_s21 = sphi %s785_s21, %s940_s21   ;;  %s735_s20 = sphi %s783_s20, %s939_s20   ;;  %s731_s19 = sphi %s781_s19, %s938_s19   ;;  %s727_s18 = sphi %s779_s18, %s937_s18  }
   0x7   : > { %s34_s26 = sadd.s32 1, %s743_s22  ;;  %s151_s27 = sadd.s32 1, %s735_s20 }
   0x8   : > { %p36_p0 = scmp.ge.s32.totalorder %s34_s26, 2  ;;  %p161_p1 = scmp.ne.s32.totalorder %s735_s20, %s731_s19 }
   0x9   : > { %p162_p2 = scmp.eq.s32.totalorder %s562_s24, 1  ;;  %p167_p3 = scmp.ne.s32.totalorder %s731_s19, %s727_s18 }
   0xa   : > { %s943_s26 = smov (%p36_p0, %s34_s26), 0  ;;  %p168_p5 = scmp.eq.s32.totalorder %s563_s25, 1 }
   0xb   : > { %p819_p4 = por %p162_p2, %p161_p1  ;;  %s146_s29 = ssub.s32 %s743_s22, %s943_s26 }
   0xc   : > { %p568_p6 = scmp.ge.s32.totalorder %s747_s23, 1  ;;  %p149_p7 = scmp.eq.s32.totalorder %s146_s29, 0 }
   0xd   : > { %p826_p8 = por %p168_p5, %p167_p3  ;;  %p236_p9 = scmp.lt.s32.totalorder %s747_s23, 3 }
   0xe   : > { %s832_s6 = scalar_select %p149_p7, %s735_s20, %s151_s27  }
   0xf   : > { %p237_p10 = pnand %p568_p6, %p236_p9 }
  0x10   : > { %p282_p11 = scmp.lt.s32.totalorder (!%p237_p10), %s739_s21, 1  ;;  %s852_s12 = sand.u32 (!%p237_p10), 1, %s731_s19  }
  0x11   : > { %240 = sbr.rel (%p237_p10) target bundleno = 99 (0x63), region = 32  ;;  %s393_s15 = scalar_lea.hbm (!%p237_p10), %s933_s4, %s739_s21 }
  0x12   : > { %s275_s16 = scalar_lea.vmem (!%p237_p10), [#allocation2], %s852_s12  ;;  %s397_s24 = sshll.u32 (!%p237_p10), %s393_s15, 4  ;;  %s398_s24 = int_to_ptr.hbm [resolvable:$true] %s397_s24 }
  0x13   : > { %s395_s17 = sshll.u32 (!%p237_p10), %s275_s16, 4  ;;  %s377_s25 = scalar_lea.sflag (!%p237_p10), [#allocation3], %s852_s12  ;;  %s396_s17 = int_to_ptr.vmem [resolvable:$true] %s395_s17 }
  0x14   : > { %s651_s27 = sshra.s32 (!%p237_p10), %s398_s24, 4  ;;  %s652_s27 = int_to_ptr.hbm [resolvable:$true] %s651_s27 }
  0x15   : > { %s653_s29 = scalar_lea.hbm (!%p237_p10), %s652_s27, 1  ;;  %p658_p1 = scmp.lt.s32.totalorder (!%p237_p10), %s652_s27, %s933_s4 }
  0x16   : > { %s836_s7 = scalar_select %p282_p11, %s739_s21, 1  ;;  %vm303_vm0 = vcmask 31744   ;;  %vm366_vm1 = vcmask 24576  }
  0x17   : > { %p654_p12 = scmp.ne.s32.totalorder %s652_s27, %s653_s29 }
  0x18   : > { %s569_s8 = sshll.u32 %s836_s7, 3 }
  0x19   : > { %s288_s11 = scalar_lea.vmem %s929_s0, %s569_s8  ;;  %p655_p13 = pnand %p654_p12, %p819_p4 }
  0x1a   : > { %v844_v0 = vld [vmem:[%s288_s11] sm:$0xff]  ;;  %s657_s11 = scalar_lea.hbm %s933_s4, 2 }
  0x1b   : > { %v304_v1 = vsel %vm303_vm0, %v844_v0, 0.0  ;;  %v311_v2 = vmul.f32 %v844_v0, %v844_v0  ;;  %p656_p0 = pneg %p655_p13  ;;  %p659_p2 = scmp.lt.s32.totalorder %s657_s11, %s653_s29 }
  0x1c   : > { %v305_v3 = vrot.slane %v304_v1, 4 }
  0x1d   : > { %v312_v4 = vsel %vm303_vm0, %v311_v2, 0.0  ;;  %p660_p3 = por %p659_p2, %p658_p1 }
  0x1e   : > { %v306_v5 = vadd.f32 %v305_v3, %v304_v1  ;;  %v313_v6 = vrot.slane %v312_v4, 4 }
  0x1f   : > { %p661_p5 = pnand %p660_p3, %p656_p0 }
  0x20   : > { %v307_v7 = vrot.slane %v306_v5, 2  ;;  %v314_v8 = vadd.f32 %v313_v6, %v312_v4 }
  0x22   : > { %v308_v9 = vadd.f32 %v307_v7, %v306_v5  ;;  %v315_v10 = vrot.slane %v314_v8, 2 }
  0x24   : > { %v309_v11 = vrot.slane %v308_v9, 1  ;;  %v316_v12 = vadd.f32 %v315_v10, %v314_v8 }
  0x26   : > { %v310_v13 = vadd.f32 %v309_v11, %v308_v9  ;;  %v317_v14 = vrot.slane %v316_v12, 1 }
  0x28   : > { %v318_v15 = vadd.f32 %v317_v14, %v316_v12  ;;  %v859_v16 = vmul.f32 0.125, %v310_v13 }
  0x2a   : > { %v320_v17 = vmul.f32 0.125, %v318_v15  ;;  %v321_v18 = vmul.f32 %v859_v16, %v859_v16  ;;  %367 = vst.msk [vmem:[%s275_s16] sm:$0x1] %vm366_vm1, %v859_v16 }
  0x2b   : > { %664 = shalt.err (!%p661_p5)
}
  0x2c   : > { %573 = dma.vmem_to_hbm [thread:$0]  (%p819_p4), %s396_s17, 16, %s398_s24, %s377_s25   ;;  %v322_v19 = vsub.f32 %v320_v17, %v321_v18 }
  0x2d   : > { %s407_s27 = scalar_lea.hbm %s934_s5, %s739_s21  ;;  %s281_s29 = scalar_lea.vmem [#allocation4], %s852_s12 }
  0x2e   : > { %v323_v20 = vmax.f32 %v322_v19, 0.0  ;;  %s409_s9 = sshll.u32 %s281_s29, 4  ;;  %s411_s17 = sshll.u32 %s407_s27, 4  ;;  %s410_s9 = int_to_ptr.vmem [resolvable:$true] %s409_s9  ;;  %s412_s17 = int_to_ptr.hbm [resolvable:$true] %s411_s17 }
  0x2f   : > { %s381_s24 = scalar_lea.sflag [#allocation5], %s852_s12  ;;  %s679_s25 = sshra.s32 %s412_s17, 4  ;;  %s680_s25 = int_to_ptr.hbm [resolvable:$true] %s679_s25 }
  0x30   : > { %v324_v21 = vadd.f32 1e-05, %v323_v20  ;;  %s681_s21 = scalar_lea.hbm %s680_s25, 1  ;;  %s685_s13 = scalar_lea.hbm %s934_s5, 2 }
  0x31   : > { %p682_p6 = scmp.ne.s32.totalorder %s680_s25, %s681_s21  ;;  %p686_p10 = scmp.lt.s32.totalorder %s680_s25, %s934_s5 }
  0x32   : > { %633 = vrsqrt.f32 %v324_v21  ;;  %vm332_vm2 = vcmp.eq.f32.partialorder %v324_v21, inf  ;;  %v335_v28 = vand.u32 2147483648, %v324_v21  ;;  %vm334_vm3 = vcmp.eq.f32.partialorder %v324_v21, 0.0  ;;  %p687_p11 = scmp.lt.s32.totalorder %s685_s13, %s681_s21 }
  0x33   : > { %p683_p7 = pnand %p682_p6, %p819_p4 }
  0x34   : > { %p688_p12 = por %p687_p11, %p686_p10 }
  0x35   : > { %p684_p9 = pneg %p683_p7 }
  0x37   : > { %p689_p13 = pnand %p688_p12, %p684_p9 }
  0x38   : > { %v634_v22 = vpop.eup %633 }
  0x39   : > { %v326_v23 = vmul.f32 %v634_v22, %v324_v21 }
  0x3b   : > { %v327_v24 = vmul.f32 %v634_v22, %v326_v23 }
  0x3d   : > { %v328_v25 = vmul.f32 0.5, %v327_v24 }
  0x3f   : > { %v329_v26 = vsub.f32 1.5, %v328_v25 }
  0x41   : > { %v330_v27 = vmul.f32 %v634_v22, %v329_v26 }
  0x43   : > { %v331_v29 = vmul.f32 %v330_v27, %v324_v21 }
  0x45   : > { %v333_v30 = vsel %vm332_vm2, %v324_v21, %v331_v29 }
  0x46   : > { %v336_v31 = vsel %vm334_vm3, %v335_v28, %v333_v30 }
  0x47   : > { %635 = vrcp.f32 %v336_v31  ;;  %368 = vst.msk [vmem:[%s281_s29] sm:$0x1] %vm366_vm1, %v336_v31 }
  0x48   : > { %692 = shalt.err (!%p689_p13)
}
  0x49   : > { %574 = dma.vmem_to_hbm [thread:$0]  (%p819_p4), %s410_s9, 16, %s412_s17, %s381_s24   ;;  %v348_v34 = vand.u32 2147483648, %v336_v31  ;;  %vm342_vm4 = vweird.f32 %v336_v31  ;;  %v346_v36 = vand.u32 2147483647, %v336_v31  ;;  %v352_v40 = vld [vmem:[%s930_s1] sm:$0x1] }
  0x4a   : > { %v353_v44 = vld [vmem:[%s931_s2] sm:$0x1]  ;;  %s301_s17 = scalar_lea.vmem %s932_s3, %s569_s8 }
  0x4b   : > { %v349_v38 = vor.u32 1.1754944e-38, %v348_v34  ;;  %vm347_vm7 = vcmp.eq.f32.partialorder %v346_v36, 8.507059e+37 }
  0x4d   : > { %v636_v32 = vpop.eup %635 }
  0x4e   : > { %v338_v33 = vmul.f32 %v636_v32, %v336_v31  ;;  %vm343_vm5 = vweird.f32 %v636_v32 }
  0x4f   : > { %vm344_vm6 = vmor %vm342_vm4, %vm343_vm5 }
  0x50   : > { %v339_v35 = vsub.f32 1.0, %v338_v33 }
  0x52   : > { %v340_v37 = vmul.f32 %v636_v32, %v339_v35 }
  0x54   : > { %v341_v39 = vadd.f32 %v636_v32, %v340_v37 }
  0x56   : > { %v345_v41 = vsel %vm344_vm6, %v636_v32, %v341_v39 }
  0x57   : > { %v350_v42 = vsel %vm347_vm7, %v349_v38, %v345_v41 }
  0x58   : > { %v354_v43 = vmul.f32 %v352_v40, %v350_v42 }
  0x5a   : > { %v355_v45 = vmul.f32 %v354_v43, %v859_v16  ;;  %v358_v46 = vperm.slane %v354_v43, 0 }
  0x5c   : > { %v356_v47 = vsub.f32 %v353_v44, %v355_v45  ;;  %v360_v48 = vmul.f32 %v358_v46, %v844_v0 }
  0x5e   : > { %v362_v49 = vperm.slane %v356_v47, 0 }
  0x60   : > { %v364_v50 = vadd.f32 %v362_v49, %v360_v48 }
  0x62   : > { %365 = vst.msk [vmem:[%s301_s17] sm:$0xff] %vm303_vm0, %v364_v50 }
  0x63 PF: > { %p584_p4 = scmp.ge.s32.totalorder %s747_s23, 2  ;;  %s433_s24 = sand.u32 1, %s727_s18  }
  0x64   : > { %s434_s25 = scalar_lea.sflag [#allocation3], %s433_s24 }
  0x65   : > { %p578_p0 = pnand %p584_p4, %p826_p8 }
  0x67   : > { %p579_p1 = pneg %p578_p0 }
  0x69   : > { %718 = dma.done.wait (%p579_p1), %s434_s25, 16  }
  0x6a   : > { %720 = vsyncadd (%p579_p1), %s434_s25, 4294967280  ;;  %s443_s7 = scalar_lea.sflag [#allocation5], %s433_s24 }
  0x6b   : > { %722 = dma.done.wait (%p579_p1), %s443_s7, 16  }
  0x6c   : > { %724 = vsyncadd (%p579_p1), %s443_s7, 4294967280  ;;  %s22_s23 = sadd.s32 1, %s747_s23   ;;  %s937_s18 = smov %s731_s19 }
  0x6d   : > { %p19_p2 = scmp.ge.s32.totalorder %s22_s23, 4   ;;  %s938_s19 = smov %s735_s20 }
  0x6e   : > { %s939_s20 = smov %s832_s6  ;;  %s940_s21 = smov %s743_s22 }
  0x6f   : > { %s941_s22 = smov %s943_s26  ;;  %21 = sbr.rel (!%p19_p2) target bundleno = 6 (0x6), region = 102 }
  0x74   :  { %448 = vsyncpa [#allocation3], 1 }
  0x75   :  { %450 = vsyncpa [#allocation3 + $0x1], 1 }
  0x76   :  { %451 = vsyncpa [#allocation5], 1 }
  0x77   :  { %453 = vsyncpa [#allocation5 + $0x1], 1 }

</bundles_post_ra>
